<compile_context>
chip_gen: v5e
topology: v5e:2x2
jax: 0.10.0
libtpu: 0.0.40
codegen_flags: <defaults>
</compile_context>

<pallas_src>
from functools import lru_cache

import numpy as np
import jax
import jax.numpy as jnp
from jax.experimental import pallas as pl
from jax.experimental.pallas import tpu as pltpu


# ----------------------------------------------------------------------------
# Host-side pool-matrix construction (cached).
# ----------------------------------------------------------------------------
def _make_pool_matrix(in_size: int, out_size: int) -> np.ndarray:
    """Averaging matrix P (out_size, in_size) matching nn.AdaptiveAvgPool2d bins."""
    P = np.zeros((out_size, in_size), dtype=np.float32)
    for i in range(out_size):
        start = (i * in_size) // out_size
        end = -((-(i + 1) * in_size) // out_size)  # ceil((i+1)*in/out)
        P[i, start:end] = 1.0 / float(end - start)
    return P


@lru_cache(maxsize=None)
def _pool_matrices_np(H, W, Oh, Ow):
    return _make_pool_matrix(H, Oh), _make_pool_matrix(W, Ow)


@lru_cache(maxsize=None)
def _kron_pt_device(H, W, Oh, Ow, pad_to, dtype):
    """kron(Ph, Pw)^T as a (pad_to, Oh*Ow) device array (zero-padded rows)."""
    ph, pw = _pool_matrices_np(H, W, Oh, Ow)
    pt = np.kron(ph, pw).T.astype(np.float32)          # (H*W, Oh*Ow)
    if pad_to > pt.shape[0]:
        pt = np.pad(pt, ((0, pad_to - pt.shape[0]), (0, 0)))
    return jnp.asarray(pt, dtype=dtype)


# ----------------------------------------------------------------------------
# Kernels.
# ----------------------------------------------------------------------------
def _fused_pool_kernel(x_ref, pt_ref, o_ref):
    # x_ref : (Bt, HW), pt_ref : (HW, OhOw) resident constant, o_ref : (Bt, OhOw)
    x = x_ref[...]
    if not jnp.issubdtype(x.dtype, jnp.floating):
        x = x.astype(jnp.float32)
    y = jnp.dot(x, pt_ref[...], preferred_element_type=jnp.float32)
    o_ref[...] = y.astype(o_ref.dtype)


def _ktiled_pool_kernel(x_ref, pt_ref, o_ref, acc_ref):
    # x_ref : (Bt, Kt), pt_ref : (Kt, OhOw), acc_ref : (Bt, OhOw) f32 scratch.
    k = pl.program_id(1)

    @pl.when(k == 0)
    def _():
        acc_ref[...] = jnp.zeros_like(acc_ref)

    x = x_ref[...]
    if not jnp.issubdtype(x.dtype, jnp.floating):
        x = x.astype(jnp.float32)
    acc_ref[...] += jnp.dot(x, pt_ref[...], preferred_element_type=jnp.float32)

    @pl.when(k == pl.num_programs(1) - 1)
    def _():
        o_ref[...] = acc_ref[...].astype(o_ref.dtype)


# ----------------------------------------------------------------------------
# Tiling heuristics.
# ----------------------------------------------------------------------------
def _round_up(x: int, m: int) -> int:
    return -(-x // m) * m


def _hw_info():
    """(physical VMEM bytes, is v7x-class) with a safe fallback."""
    try:
        vmem_cap = int(pltpu.get_tpu_info().vmem_capacity_bytes)
    except Exception:
        vmem_cap = 64 << 20
    v7x_like = vmem_cap <= (64 << 20) + (1 << 20)   # 64 MiB VMEM => v7x-class
    return vmem_cap, v7x_like


def _choose_block_b(B, row_bytes, sublane, target_bytes, want_even_steps):
    """Rows of the flattened batch axis per grid step (sublane-aligned)."""
    bt0 = max(sublane, target_bytes // max(1, row_bytes))
    if bt0 >= B:
        # One block covers everything; on 2-TC chips split into 2 balanced steps.
        if want_even_steps and B >= 2 * sublane:
            return min(B, _round_up(-(-B // 2), sublane))
        return B
    steps = -(-B // bt0)
    if want_even_steps and steps % 2:
        steps += 1
    bt = _round_up(-(-B // steps), sublane)
    if bt >= B:
        return B
    if want_even_steps:
        actual = -(-B // bt)
        if actual > 1 and actual % 2:
            bt2 = _round_up(-(-B // (actual + 1)), sublane)
            if 0 < bt2 < B:
                bt = bt2
    return bt


def _choose_kt(HW, kt_cap):
    """Contraction chunk (multiple of 128) and padded contraction length."""
    HW128 = _round_up(HW, 128)
    q = HW128 // 128
    max_d = max(1, min(kt_cap, HW128) // 128)
    best = max(d for d in range(1, max_d + 1) if q % d == 0)
    ideal_steps = -(-HW128 // (max_d * 128))
    if -(-q // best) > 2 * ideal_steps:
        kt = max_d * 128          # no good divisor (prime-ish): pad the tail
    else:
        kt = best * 128
    return kt, _round_up(HW128, kt)


# ----------------------------------------------------------------------------
# Public wrapper (equivalent of InputResizer(output_size)(x) for NCHW input).
# ----------------------------------------------------------------------------
def input_resizer(x: jax.Array, output_size, *, kron_cap_bytes=None, max_kt=None):
    N, C, H, W = x.shape
    Oh, Ow = output_size
    B, HW, OhOw = N * C, H * W, Oh * Ow

    itemsize = np.dtype(x.dtype).itemsize
    sublane = 8 * max(1, 4 // itemsize)              # 8 f32 / 16 bf16 / 32 int8

    vmem_cap, v7x_like = _hw_info()
    vmem_ceiling = max(vmem_cap - (8 << 20), 24 << 20)
    target_bytes = (8 << 20) if v7x_like else (4 << 20)

    # Pool matrix in bf16 for bf16 inputs (no in-kernel f32 up-cast of x).
    pm_dtype = np.dtype(jnp.bfloat16) if x.dtype == jnp.bfloat16 else np.dtype(np.float32)
    pm_itemsize = pm_dtype.itemsize
    kron_bytes = HW * OhOw * pm_itemsize

    if kron_cap_bytes is None:
        kron_cap_bytes = (6 << 20) if v7x_like else (10 << 20)
    use_fused = kron_bytes <= kron_cap_bytes

    x_flat = x.reshape(B, HW)                        # free contiguous view

    if use_fused:
        # ---------------- single lane-dense GEMM ----------------
        Bt = _choose_block_b(B, HW * itemsize, sublane, target_bytes, v7x_like)
        grid = (pl.cdiv(B, Bt),)
        pt = _kron_pt_device(H, W, Oh, Ow, HW, pm_dtype)
        vmem_needed = (2 * Bt * HW * itemsize + 2 * Bt * OhOw * itemsize
                       + 2 * kron_bytes + (2 << 20))
        vmem_limit = int(min(vmem_ceiling, max(32 << 20, vmem_needed)))

        def build(single_buffer_const):
            const_kwargs = ({"pipeline_mode": pl.Buffered(1)}
                            if single_buffer_const else {})
            return pl.pallas_call(
                _fused_pool_kernel,
                out_shape=jax.ShapeDtypeStruct((B, OhOw), x.dtype),
                grid_spec=pltpu.PrefetchScalarGridSpec(
                    num_scalar_prefetch=0,
                    grid=grid,
                    in_specs=[
                        pl.BlockSpec((Bt, HW), lambda b: (b, 0)),
                        pl.BlockSpec((HW, OhOw), lambda b: (0, 0), **const_kwargs),
                    ],
                    out_specs=pl.BlockSpec((Bt, OhOw), lambda b: (b, 0)),
                ),
                compiler_params=pltpu.CompilerParams(
                    dimension_semantics=("parallel",),
                    vmem_limit_bytes=vmem_limit,
                ),
            )

        try:
            out_flat = build(True)(x_flat, pt)
        except Exception:
            # Fallback if this Pallas version rejects single-buffering.
            out_flat = build(False)(x_flat, pt)
        return out_flat.reshape(N, C, Oh, Ow)

    # ---------------- K-tiled accumulating GEMM ----------------
    kt_cap = (2 << 20) // max(1, OhOw * pm_itemsize)
    kt_cap = max(128, min(4096, (kt_cap // 128) * 128))
    if max_kt is not None:
        kt_cap = max(128, min(kt_cap, (max_kt // 128) * 128))
    Kt, HW_pad = _choose_kt(HW, kt_cap)
    num_k = HW_pad // Kt

    Bt = _choose_block_b(B, Kt * itemsize, sublane, target_bytes, v7x_like)
    grid = (pl.cdiv(B, Bt), num_k)

    pt = _kron_pt_device(H, W, Oh, Ow, HW_pad, pm_dtype)
    if HW_pad != HW:
        # Zero-pad the contraction axis so every K block is exact (zeros are
        # inert in the dot; avoids garbage from a ragged last block).
        x_flat = jnp.pad(x_flat, ((0, 0), (0, HW_pad - HW)))

    vmem_needed = (2 * Bt * Kt * itemsize + 2 * Kt * OhOw * pm_itemsize
                   + 2 * Bt * OhOw * itemsize + Bt * OhOw * 4 + (2 << 20))
    vmem_limit = int(min(vmem_ceiling, max(32 << 20, vmem_needed)))

    out_flat = pl.pallas_call(
        _ktiled_pool_kernel,
        out_shape=jax.ShapeDtypeStruct((B, OhOw), x.dtype),
        grid_spec=pltpu.PrefetchScalarGridSpec(
            num_scalar_prefetch=0,
            grid=grid,
            in_specs=[
                pl.BlockSpec((Bt, Kt), lambda b, k: (b, k)),
                pl.BlockSpec((Kt, OhOw), lambda b, k: (k, 0)),
            ],
            out_specs=pl.BlockSpec((Bt, OhOw), lambda b, k: (b, 0)),
            scratch_shapes=[pltpu.VMEM((Bt, OhOw), jnp.float32)],
        ),
        compiler_params=pltpu.CompilerParams(
            dimension_semantics=("parallel", "arbitrary"),
            vmem_limit_bytes=vmem_limit,
        ),
    )(x_flat, pt)
    return out_flat.reshape(N, C, Oh, Ow)


# ----------------------------------------------------------------------------
# Pure-numpy reference matching nn.AdaptiveAvgPool2d exactly.
# ----------------------------------------------------------------------------
def _reference_adaptive_pool(x: jax.Array, output_size) -> jax.Array:
    N, C, H, W = x.shape
    Oh, Ow = output_size
    out = np.zeros((N, C, Oh, Ow), dtype=np.float32)
    xn = np.asarray(x).astype(np.float32)
    for i in range(Oh):
        hs = (i * H) // Oh
        he = -((-(i + 1) * H) // Oh)
        for j in range(Ow):
            ws = (j * W) // Ow
            we = -((-(j + 1) * W) // Ow)
            out[:, :, i, j] = xn[:, :, hs:he, ws:we].mean(axis=(2, 3))
    return jnp.asarray(out, dtype=x.dtype)


if __name__ == "__main__":
    key = jax.random.PRNGKey(0)

    # Case 1: canonical small shape -> fused single-GEMM path.
    N, C, H, W = 2, 4, 16, 16
    out_sz = (7, 7)                    # non-divisible bins
    x = jax.random.normal(key, (N, C, H, W), dtype=jnp.float32)
    y = jax.block_until_ready(input_resizer(x, out_sz))
    np.testing.assert_allclose(np.asarray(y),
                               np.asarray(_reference_adaptive_pool(x, out_sz)),
                               rtol=1e-5, atol=1e-5)

    # Case 2: odd sizes + batch axis that does not divide the block
    # (multi-step grid with a padded edge block).
    x2 = jax.random.normal(jax.random.PRNGKey(1), (2, 17, 12, 10), dtype=jnp.float32)
    y2 = jax.block_until_ready(input_resizer(x2, (5, 3)))
    np.testing.assert_allclose(np.asarray(y2),
                               np.asarray(_reference_adaptive_pool(x2, (5, 3))),
                               rtol=1e-5, atol=1e-5)

    # Case 3: force the K-tiled accumulating path with >1 contraction chunk
    # (exercises the f32 scratch accumulator and pl.when init/writeback).
    y3 = jax.block_until_ready(
        input_resizer(x, out_sz, kron_cap_bytes=0, max_kt=128))
    np.testing.assert_allclose(np.asarray(y3),
                               np.asarray(_reference_adaptive_pool(x, out_sz)),
                               rtol=1e-5, atol=1e-5)

    # Case 4: bf16 input -> bf16 pool matrix, f32 MXU accumulation.
    xb = x.astype(jnp.bfloat16)
    yb = jax.block_until_ready(input_resizer(xb, out_sz))
    np.testing.assert_allclose(
        np.asarray(yb).astype(np.float32),
        np.asarray(_reference_adaptive_pool(xb, out_sz)).astype(np.float32),
        rtol=3e-2, atol=3e-2)

    print("KERNEL_OK")
</pallas_src>

<mosaic_0001>
module attributes {stable_mosaic.version = 11 : i64} {
  func.func @_fused_pool_kernel(%arg0: i32, %arg1: memref<8x256xf32, #tpu.memory_space<vmem>>, %arg2: memref<256x49xf32, #tpu.memory_space<vmem>>, %arg3: memref<8x49xf32, #tpu.memory_space<vmem>>) attributes {dimension_semantics = [#tpu.dimension_semantics<parallel>], iteration_bounds = array<i64: 1>, scalar_prefetch = 0 : i64, scratch_operands = 0 : i64, tpu.core_type = #tpu.core_type<tc>, window_params = [{transform_indices = @transform_0, window_bounds = array<i64: 8, 256>}, {pipeline_mode = #tpu.pipeline_mode<synchronous>, transform_indices = @transform_1, window_bounds = array<i64: 256, 49>}, {transform_indices = @transform_2, window_bounds = array<i64: 8, 49>}]} {
    %c0 = arith.constant 0 : index
    %c0_0 = arith.constant 0 : index
    %0 = vector.load %arg1[%c0, %c0_0] : memref<8x256xf32, #tpu.memory_space<vmem>>, vector<8x256xf32>
    %c0_1 = arith.constant 0 : index
    %c0_2 = arith.constant 0 : index
    %1 = vector.load %arg2[%c0_1, %c0_2] : memref<256x49xf32, #tpu.memory_space<vmem>>, vector<256x49xf32>
    %cst = arith.constant dense<0.000000e+00> : vector<8x49xf32>
    %2 = tpu.matmul %0, %1, %cst {dimension_numbers = #tpu.dot_dimension_numbers<[1], [0], [0], [1], [0, 0, 1, 1], [], []>} : vector<8x256xf32>, vector<256x49xf32>, vector<8x49xf32> -> vector<8x49xf32>
    %c0_3 = arith.constant 0 : index
    %c0_4 = arith.constant 0 : index
    %3 = vector.load %arg3[%c0_3, %c0_4] : memref<8x49xf32, #tpu.memory_space<vmem>>, vector<8x49xf32>
    tpu.vector_store %arg3[%c0_3, %c0_4], %2 {strides = array<i32>} : memref<8x49xf32, #tpu.memory_space<vmem>>, vector<8x49xf32>,
    return
  }
  func.func @transform_0(%arg0: i32) -> (i32, i32) {
    %c0_i32 = arith.constant 0 : i32
    %c0_i32_0 = arith.constant 0 : i32
    return %arg0, %c0_i32 : i32, i32
  }
  func.func @transform_1(%arg0: i32) -> (i32, i32) {
    %c0_i32 = arith.constant 0 : i32
    %c0_i32_0 = arith.constant 0 : i32
    %c0_i32_1 = arith.constant 0 : i32
    return %c0_i32, %c0_i32_0 : i32, i32
  }
  func.func @transform_2(%arg0: i32) -> (i32, i32) {
    %c0_i32 = arith.constant 0 : i32
    %c0_i32_0 = arith.constant 0 : i32
    return %arg0, %c0_i32 : i32, i32
  }
}

module attributes {stable_mosaic.version = 11 : i64} {
  func.func @_fused_pool_kernel(%arg0: i32, %arg1: memref<8x256xf32, #tpu.memory_space<vmem>>, %arg2: memref<256x49xf32, #tpu.memory_space<vmem>>, %arg3: memref<8x49xf32, #tpu.memory_space<vmem>>) attributes {dimension_semantics = [#tpu.dimension_semantics<parallel>], iteration_bounds = array<i64: 1>, scalar_prefetch = 0 : i64, scratch_operands = 0 : i64, tpu.core_type = #tpu.core_type<tc>, window_params = [{transform_indices = @transform_0, window_bounds = array<i64: 8, 256>}, {pipeline_mode = #tpu.pipeline_mode<synchronous>, transform_indices = @transform_1, window_bounds = array<i64: 256, 49>}, {transform_indices = @transform_2, window_bounds = array<i64: 8, 49>}]} {
    %c0 = arith.constant 0 : index
    %c0_0 = arith.constant 0 : index
    %0 = vector.load %arg1[%c0, %c0_0] : memref<8x256xf32, #tpu.memory_space<vmem>>, vector<8x256xf32>
    %c0_1 = arith.constant 0 : index
    %c0_2 = arith.constant 0 : index
    %1 = vector.load %arg2[%c0_1, %c0_2] : memref<256x49xf32, #tpu.memory_space<vmem>>, vector<256x49xf32>
    %cst = arith.constant dense<0.000000e+00> : vector<8x49xf32>
    %2 = tpu.matmul %0, %1, %cst {dimension_numbers = #tpu.dot_dimension_numbers<[1], [0], [0], [1], [0, 0, 1, 1], [], []>} : vector<8x256xf32>, vector<256x49xf32>, vector<8x49xf32> -> vector<8x49xf32>
    %c0_3 = arith.constant 0 : index
    %c0_4 = arith.constant 0 : index
    %3 = vector.load %arg3[%c0_3, %c0_4] : memref<8x49xf32, #tpu.memory_space<vmem>>, vector<8x49xf32>
    tpu.vector_store %arg3[%c0_3, %c0_4], %2 {strides = array<i32>} : memref<8x49xf32, #tpu.memory_space<vmem>>, vector<8x49xf32>,
    return
  }
  func.func @transform_0(%arg0: i32) -> (i32, i32) {
    %c0_i32 = arith.constant 0 : i32
    %c0_i32_0 = arith.constant 0 : i32
    return %arg0, %c0_i32 : i32, i32
  }
  func.func @transform_1(%arg0: i32) -> (i32, i32) {
    %c0_i32 = arith.constant 0 : i32
    %c0_i32_0 = arith.constant 0 : i32
    %c0_i32_1 = arith.constant 0 : i32
    return %c0_i32, %c0_i32_0 : i32, i32
  }
  func.func @transform_2(%arg0: i32) -> (i32, i32) {
    %c0_i32 = arith.constant 0 : i32
    %c0_i32_0 = arith.constant 0 : i32
    return %arg0, %c0_i32 : i32, i32
  }
}

</mosaic_0001>

<bundles_post_ra>
// kernel: tpu_custom_call.1
= control target key start
LH: loop header
LB: loop body
LE: loop exit
PB: predicated region body
PF: predicated region fallthrough
CT: control target
= control target key end

     0   :  { %s252_s0 = inlined_call_operand.vmem [shape: f32[8,256], index: 0, kind: input, shape index: {}]   ;;  %s253_s1 = inlined_call_operand.vmem [shape: f32[256,49], index: 1, kind: input, shape index: {}]   ;;  %s254_s2 = inlined_call_operand.hbm [shape: f32[8,49], index: 2, kind: output, shape index: {}]  }
   0x1   :  { %v29_v0 = vld [vmem:[%s253_s1 + $0x78] sm:$0xff]  ;;  %v28_v2 = vld [vmem:[%s253_s1 + $0x70] sm:$0xff]  ;;  %v27_v4 = vld [vmem:[%s253_s1 + $0x68] sm:$0xff] }
   0x2   :  { %v45_v1 = vld [vmem:[%s253_s1 + $0xf8] sm:$0xff]  ;;  %46 = vmatpush.msra.mxu0 %v29_v0  ;;  %v44_v3 = vld [vmem:[%s253_s1 + $0xf0] sm:$0xff]  ;;  %v43_v5 = vld [vmem:[%s253_s1 + $0xe8] sm:$0xff] }
   0x3   :  { %66 = vmatpush.msra.mxu1 %v45_v1  ;;  %v26_v6 = vld [vmem:[%s253_s1 + $0x60] sm:$0xff]  ;;  %v25_v8 = vld [vmem:[%s253_s1 + $0x58] sm:$0xff]  ;;  %v24_v10 = vld [vmem:[%s253_s1 + $0x50] sm:$0xff] }
   0x4   :  { %47 = vmatpush.msra.mxu0 %v28_v2  ;;  %v42_v7 = vld [vmem:[%s253_s1 + $0xe0] sm:$0xff]  ;;  %v41_v9 = vld [vmem:[%s253_s1 + $0xd8] sm:$0xff]  ;;  %v40_v11 = vld [vmem:[%s253_s1 + $0xd0] sm:$0xff] }
   0x5   :  { %67 = vmatpush.msra.mxu1 %v44_v3  ;;  %v23_v12 = vld [vmem:[%s253_s1 + $0x48] sm:$0xff] }
   0x6   :  { %48 = vmatpush.msra.mxu0 %v27_v4  ;;  %v39_v13 = vld [vmem:[%s253_s1 + $0xc8] sm:$0xff] }
   0x7   :  { %68 = vmatpush.msra.mxu1 %v43_v5 }
   0x8   :  { %49 = vmatpush.msra.mxu0 %v26_v6 }
   0x9   :  { %69 = vmatpush.msra.mxu1 %v42_v7 }
   0xa   :  { %50 = vmatpush.msra.mxu0 %v25_v8 }
   0xb   :  { %70 = vmatpush.msra.mxu1 %v41_v9 }
   0xc   :  { %51 = vmatpush.msra.mxu0 %v24_v10 }
   0xd   :  { %71 = vmatpush.msra.mxu1 %v40_v11 }
   0xe   :  { %7 = vsyncpa [#allocation3], 0  ;;  %v22_v14 = vld [vmem:[%s253_s1 + $0x40] sm:$0xff]  ;;  %52 = vmatpush.msra.mxu0 %v23_v12  ;;  %v21_v16 = vld [vmem:[%s253_s1 + $0x38] sm:$0xff]  ;;  %s131_s21 = smov [#allocation2]   ;;  %vm86_vm0 = vcmask 400384  }
   0xf   :  { %v38_v15 = vld [vmem:[%s253_s1 + $0xc0] sm:$0xff]  ;;  %72 = vmatpush.msra.mxu1 %v39_v13  ;;  %v37_v17 = vld [vmem:[%s253_s1 + $0xb8] sm:$0xff]  ;;  %v20_v18 = vld [vmem:[%s253_s1 + $0x30] sm:$0xff]  ;;  %s93_s22 = sshll.u32 %s131_s21, 4  ;;  %s94_s22 = int_to_ptr.vmem [resolvable:$true] %s93_s22 }
  0x10   :  { %53 = vmatpush.msra.mxu0 %v22_v14  ;;  %v36_v19 = vld [vmem:[%s253_s1 + $0xb0] sm:$0xff]  ;;  %v19_v20 = vld [vmem:[%s253_s1 + $0x28] sm:$0xff]  ;;  %v18_v22 = vld [vmem:[%s253_s1 + $0x20] sm:$0xff] }
  0x11   :  { %73 = vmatpush.msra.mxu1 %v38_v15  ;;  %v35_v21 = vld [vmem:[%s253_s1 + $0xa8] sm:$0xff]  ;;  %v34_v23 = vld [vmem:[%s253_s1 + $0xa0] sm:$0xff]  ;;  %v17_v24 = vld [vmem:[%s253_s1 + $0x18] sm:$0xff] }
  0x12   :  { %54 = vmatpush.msra.mxu0 %v21_v16  ;;  %v33_v25 = vld [vmem:[%s253_s1 + $0x98] sm:$0xff]  ;;  %v16_v26 = vld [vmem:[%s253_s1 + $0x10] sm:$0xff]  ;;  %v15_v28 = vld [vmem:[%s253_s1 + $0x8] sm:$0xff] }
  0x13   :  { %74 = vmatpush.msra.mxu1 %v37_v17  ;;  %v32_v27 = vld [vmem:[%s253_s1 + $0x90] sm:$0xff]  ;;  %v31_v29 = vld [vmem:[%s253_s1 + $0x88] sm:$0xff]  ;;  %v14_v30 = vld [vmem:[%s253_s1] sm:$0xff] }
  0x14   :  { %55 = vmatpush.msra.mxu0 %v20_v18  ;;  %v30_v31 = vld [vmem:[%s253_s1 + $0x80] sm:$0xff]  ;;  %v13_v33 = vld [vmem:[%s252_s0 + $0x8] sm:$0xff]  ;;  %s95_s1 = sshll.u32 %s254_s2, 4  ;;  %s96_s1 = int_to_ptr.hbm [resolvable:$true] %s95_s1 }
  0x15   :  { %75 = vmatpush.msra.mxu1 %v36_v19  ;;  %v12_v32 = vld [vmem:[%s252_s0] sm:$0xff] }
  0x16   :  { %56 = vmatpush.msra.mxu0 %v19_v20 }
  0x17   :  { %76 = vmatpush.msra.mxu1 %v35_v21 }
  0x18   :  { %57 = vmatpush.msra.mxu0 %v18_v22 }
  0x19   :  { %77 = vmatpush.msra.mxu1 %v34_v23 }
  0x1a   :  { %58 = vmatpush.msra.mxu0 %v17_v24 }
  0x1b   :  { %78 = vmatpush.msra.mxu1 %v33_v25 }
  0x1c   :  { %59 = vmatpush.msra.mxu0 %v16_v26 }
  0x1d   :  { %79 = vmatpush.msra.mxu1 %v32_v27 }
  0x1e   :  { %60 = vmatpush.msra.mxu0 %v15_v28 }
  0x1f   :  { %80 = vmatpush.msra.mxu1 %v31_v29 }
  0x20   :  { %61 = vmatpush.msra.mxu0 %v14_v30 }
  0x21   :  { %81 = vmatpush.msra.mxu1 %v30_v31  ;;  %62 = vmatmul.f32.vlgmr.msra.gmra.mxu0 %v12_v32 }
  0x22   :  { %82 = vmatmul.f32.vlgmr.msra.gmra.mxu1 %v13_v33 }
  0x9e   :  { %v63_v34 = vpop.f32.mrf.mxu0 }
  0x9f   :  { %v83_v35 = vpop.f32.mrf.mxu1 }
  0xa0   :  { %v84_v36 = vadd.f32 %v83_v35, %v63_v34 }
  0xa2   :  { %87 = vst.msk [vmem:[#allocation2] sm:$0xff] %vm86_vm0, %v84_v36 }
  0xa3   :  { %98 = dma.vmem_to_hbm [thread:$0]  %s94_s22, 128, %s96_s1, [#allocation3]  }
  0xa4   :  { %129 = dma.done.wait [#allocation3], 128  }
  0xa5   :  { %130 = vsyncadd [#allocation3], 4294967168 }
  0xa6   :  { %103 = vsyncpa [#allocation3], 1 }

// kernel: tpu_custom_call.1
= control target key start
LH: loop header
LB: loop body
LE: loop exit
PB: predicated region body
PF: predicated region fallthrough
CT: control target
= control target key end

     0   :  { %s252_s0 = inlined_call_operand.vmem [shape: f32[8,256], index: 0, kind: input, shape index: {}]   ;;  %s253_s1 = inlined_call_operand.vmem [shape: f32[256,49], index: 1, kind: input, shape index: {}]   ;;  %s254_s2 = inlined_call_operand.hbm [shape: f32[8,49], index: 2, kind: output, shape index: {}]  }
   0x1   :  { %v29_v0 = vld [vmem:[%s253_s1 + $0x78] sm:$0xff]  ;;  %v28_v2 = vld [vmem:[%s253_s1 + $0x70] sm:$0xff]  ;;  %v27_v4 = vld [vmem:[%s253_s1 + $0x68] sm:$0xff] }
   0x2   :  { %v45_v1 = vld [vmem:[%s253_s1 + $0xf8] sm:$0xff]  ;;  %46 = vmatpush.msra.mxu0 %v29_v0  ;;  %v44_v3 = vld [vmem:[%s253_s1 + $0xf0] sm:$0xff]  ;;  %v43_v5 = vld [vmem:[%s253_s1 + $0xe8] sm:$0xff] }
   0x3   :  { %66 = vmatpush.msra.mxu1 %v45_v1  ;;  %v26_v6 = vld [vmem:[%s253_s1 + $0x60] sm:$0xff]  ;;  %v25_v8 = vld [vmem:[%s253_s1 + $0x58] sm:$0xff]  ;;  %v24_v10 = vld [vmem:[%s253_s1 + $0x50] sm:$0xff] }
   0x4   :  { %47 = vmatpush.msra.mxu0 %v28_v2  ;;  %v42_v7 = vld [vmem:[%s253_s1 + $0xe0] sm:$0xff]  ;;  %v41_v9 = vld [vmem:[%s253_s1 + $0xd8] sm:$0xff]  ;;  %v40_v11 = vld [vmem:[%s253_s1 + $0xd0] sm:$0xff] }
   0x5   :  { %67 = vmatpush.msra.mxu1 %v44_v3  ;;  %v23_v12 = vld [vmem:[%s253_s1 + $0x48] sm:$0xff] }
   0x6   :  { %48 = vmatpush.msra.mxu0 %v27_v4  ;;  %v39_v13 = vld [vmem:[%s253_s1 + $0xc8] sm:$0xff] }
   0x7   :  { %68 = vmatpush.msra.mxu1 %v43_v5 }
   0x8   :  { %49 = vmatpush.msra.mxu0 %v26_v6 }
   0x9   :  { %69 = vmatpush.msra.mxu1 %v42_v7 }
   0xa   :  { %50 = vmatpush.msra.mxu0 %v25_v8 }
   0xb   :  { %70 = vmatpush.msra.mxu1 %v41_v9 }
   0xc   :  { %51 = vmatpush.msra.mxu0 %v24_v10 }
   0xd   :  { %71 = vmatpush.msra.mxu1 %v40_v11 }
   0xe   :  { %7 = vsyncpa [#allocation3], 0  ;;  %v22_v14 = vld [vmem:[%s253_s1 + $0x40] sm:$0xff]  ;;  %52 = vmatpush.msra.mxu0 %v23_v12  ;;  %v21_v16 = vld [vmem:[%s253_s1 + $0x38] sm:$0xff]  ;;  %s131_s21 = smov [#allocation2]   ;;  %vm86_vm0 = vcmask 400384  }
   0xf   :  { %v38_v15 = vld [vmem:[%s253_s1 + $0xc0] sm:$0xff]  ;;  %72 = vmatpush.msra.mxu1 %v39_v13  ;;  %v37_v17 = vld [vmem:[%s253_s1 + $0xb8] sm:$0xff]  ;;  %v20_v18 = vld [vmem:[%s253_s1 + $0x30] sm:$0xff]  ;;  %s93_s22 = sshll.u32 %s131_s21, 4  ;;  %s94_s22 = int_to_ptr.vmem [resolvable:$true] %s93_s22 }
  0x10   :  { %53 = vmatpush.msra.mxu0 %v22_v14  ;;  %v36_v19 = vld [vmem:[%s253_s1 + $0xb0] sm:$0xff]  ;;  %v19_v20 = vld [vmem:[%s253_s1 + $0x28] sm:$0xff]  ;;  %v18_v22 = vld [vmem:[%s253_s1 + $0x20] sm:$0xff] }
  0x11   :  { %73 = vmatpush.msra.mxu1 %v38_v15  ;;  %v35_v21 = vld [vmem:[%s253_s1 + $0xa8] sm:$0xff]  ;;  %v34_v23 = vld [vmem:[%s253_s1 + $0xa0] sm:$0xff]  ;;  %v17_v24 = vld [vmem:[%s253_s1 + $0x18] sm:$0xff] }
  0x12   :  { %54 = vmatpush.msra.mxu0 %v21_v16  ;;  %v33_v25 = vld [vmem:[%s253_s1 + $0x98] sm:$0xff]  ;;  %v16_v26 = vld [vmem:[%s253_s1 + $0x10] sm:$0xff]  ;;  %v15_v28 = vld [vmem:[%s253_s1 + $0x8] sm:$0xff] }
  0x13   :  { %74 = vmatpush.msra.mxu1 %v37_v17  ;;  %v32_v27 = vld [vmem:[%s253_s1 + $0x90] sm:$0xff]  ;;  %v31_v29 = vld [vmem:[%s253_s1 + $0x88] sm:$0xff]  ;;  %v14_v30 = vld [vmem:[%s253_s1] sm:$0xff] }
  0x14   :  { %55 = vmatpush.msra.mxu0 %v20_v18  ;;  %v30_v31 = vld [vmem:[%s253_s1 + $0x80] sm:$0xff]  ;;  %v13_v33 = vld [vmem:[%s252_s0 + $0x8] sm:$0xff]  ;;  %s95_s1 = sshll.u32 %s254_s2, 4  ;;  %s96_s1 = int_to_ptr.hbm [resolvable:$true] %s95_s1 }
  0x15   :  { %75 = vmatpush.msra.mxu1 %v36_v19  ;;  %v12_v32 = vld [vmem:[%s252_s0] sm:$0xff] }
  0x16   :  { %56 = vmatpush.msra.mxu0 %v19_v20 }
  0x17   :  { %76 = vmatpush.msra.mxu1 %v35_v21 }
  0x18   :  { %57 = vmatpush.msra.mxu0 %v18_v22 }
  0x19   :  { %77 = vmatpush.msra.mxu1 %v34_v23 }
  0x1a   :  { %58 = vmatpush.msra.mxu0 %v17_v24 }
  0x1b   :  { %78 = vmatpush.msra.mxu1 %v33_v25 }
  0x1c   :  { %59 = vmatpush.msra.mxu0 %v16_v26 }
  0x1d   :  { %79 = vmatpush.msra.mxu1 %v32_v27 }
  0x1e   :  { %60 = vmatpush.msra.mxu0 %v15_v28 }
  0x1f   :  { %80 = vmatpush.msra.mxu1 %v31_v29 }
  0x20   :  { %61 = vmatpush.msra.mxu0 %v14_v30 }
  0x21   :  { %81 = vmatpush.msra.mxu1 %v30_v31  ;;  %62 = vmatmul.f32.vlgmr.msra.gmra.mxu0 %v12_v32 }
  0x22   :  { %82 = vmatmul.f32.vlgmr.msra.gmra.mxu1 %v13_v33 }
  0x9e   :  { %v63_v34 = vpop.f32.mrf.mxu0 }
  0x9f   :  { %v83_v35 = vpop.f32.mrf.mxu1 }
  0xa0   :  { %v84_v36 = vadd.f32 %v83_v35, %v63_v34 }
  0xa2   :  { %87 = vst.msk [vmem:[#allocation2] sm:$0xff] %vm86_vm0, %v84_v36 }
  0xa3   :  { %98 = dma.vmem_to_hbm [thread:$0]  %s94_s22, 128, %s96_s1, [#allocation3]  }
  0xa4   :  { %129 = dma.done.wait [#allocation3], 128  }
  0xa5   :  { %130 = vsyncadd [#allocation3], 4294967168 }
  0xa6   :  { %103 = vsyncpa [#allocation3], 1 }

</bundles_post_ra>
